<compile_context>
chip_gen: v7x
topology: tpu7x:2x2x1
jax: 0.10.0
libtpu: 0.0.40
codegen_flags: <defaults>
</compile_context>

<pallas_src>
import numpy as np
import jax
import jax.numpy as jnp
from jax import lax
from jax.experimental import pallas as pl
from jax.experimental.pallas import tpu as pltpu

_PREC = lax.Precision.HIGHEST


def _hdot(a, b):
    """f32-accurate MXU matmul (keeps beta propagation out of bf16 rounding)."""
    return jnp.dot(a, b, preferred_element_type=jnp.float32, precision=_PREC)


def _uni_bhtmm_kernel(b_all_ref, pi_all_ref, a_blk_ref, sum_mat_ref, exp_mat_ref,
                      onehot_x_ref, leaf_mask_ref, tree_mat_ref,
                      g_ch_ref, s_pa_ref, upd_ref,
                      out_ref, beta_s, ll_s, bnodes_s):
    lvl = pl.program_id(0)

    # ---- grid step 0: leaf initialisation (scratch persists across levels) --
    @pl.when(lvl == 0)
    def _init():
        # Emission likelihood of every node, all generations at once:
        #   bnodes[n, g*C + c] = B_g[c, x_n]
        b_nodes = _hdot(onehot_x_ref[...], b_all_ref[...])        # [N, G*C]
        bnodes_s[...] = b_nodes
        leaf = leaf_mask_ref[...]                                 # [N, 1]
        beta_leaf = pi_all_ref[...] * b_nodes                     # [N, G*C]
        nu0 = _hdot(beta_leaf, sum_mat_ref[...])                  # [N, G]  per-gen sum
        nu0 = leaf * nu0 + (1.0 - leaf)                           # safe at internals
        inv0 = _hdot(1.0 / nu0, exp_mat_ref[...])                 # [N, G*C] broadcast
        beta_s[...] = leaf * (beta_leaf * inv0)
        ll_s[...] = leaf * jnp.log(nu0)

    # ---- one upward level: children -> parents (all generations at once) ----
    beta_ch = _hdot(g_ch_ref[...], beta_s[...])                   # [E, G*C]  gather
    t_beta_ch = _hdot(beta_ch, a_blk_ref[...])                    # [E, G*C]  A_g^T per gen
    t_beta = _hdot(s_pa_ref[...], t_beta_ch)                      # [N, G*C]  scatter-mean

    upd = upd_ref[...]                                            # [N, 1] parents of level
    beta_l = bnodes_s[...] * t_beta                               # [N, G*C]
    nu = _hdot(beta_l, sum_mat_ref[...])                          # [N, G]
    nu = upd * nu + (1.0 - upd)                                   # safe at non-parents
    inv = _hdot(1.0 / nu, exp_mat_ref[...])                       # [N, G*C]
    beta_s[...] = upd * (beta_l * inv) + (1.0 - upd) * beta_s[...]
    ll_s[...] = upd * jnp.log(nu) + (1.0 - upd) * ll_s[...]

    # ---- last level: per-tree sum of node log-likelihoods, lane-dense store -
    @pl.when(lvl == pl.num_programs(0) - 1)
    def _finalize():
        out_ref[...] = _hdot(tree_mat_ref[...], ll_s[...])        # [T, G]


def uni_bhtmm_forward(lam_A, lam_B, lam_Pi, onehot_x, leaf_mask,
                      gather_ch, scatter_pa, upd_mask, tree_mat):
    """lam_A: [C,C,G], lam_B: [C,M,G], lam_Pi: [C,G] (torch layouts)."""
    C, _, G = lam_A.shape
    M = lam_B.shape[1]
    GC = G * C
    N = onehot_x.shape[0]
    L, E, _ = gather_ch.shape
    T = tree_mat.shape[0]

    # --- parameter softmax + generation-major lane packing (tiny; fused by jit)
    A = jax.nn.softmax(lam_A, axis=0)                       # softmax(A[:,:,g], dim=0)
    B = jax.nn.softmax(lam_B, axis=1)                       # softmax(B[:,:,g], dim=1)
    Pi = jax.nn.softmax(lam_Pi, axis=0)                     # softmax(Pi[:,g],  dim=0)

    b_all = jnp.transpose(B, (1, 2, 0)).reshape(M, GC)      # b_all[m, g*C+c] = B[c,m,g]
    pi_all = jnp.transpose(Pi, (1, 0)).reshape(1, GC)       # pi_all[0, g*C+c] = Pi[c,g]
    a_t = jnp.transpose(A, (2, 1, 0))                       # a_t[g, j, i] = A[i, j, g]
    eye_g = jnp.eye(G, dtype=jnp.float32)
    # block-diagonal [G*C, G*C]: block g = A_g^T so (beta @ a_blk) applies A per gen
    a_blk = (eye_g[:, None, :, None] * a_t[:, :, None, :]).reshape(GC, GC)
    sum_mat = jnp.repeat(eye_g, C, axis=0)                  # [G*C, G]: per-gen lane sum
    exp_mat = sum_mat.T                                     # [G, G*C]: per-gen broadcast

    # --- VMEM budget & cost hints (all static python ints)
    f32 = 4
    resident = f32 * (N * M + N + T * N + M * GC + GC * GC + GC + 2 * GC * G + T * G)
    streamed = 2 * f32 * (E * N + N * E + N)                # double-buffered level blocks
    scratch = f32 * N * (2 * GC + G)
    vmem_limit = int(min(max(resident + streamed + scratch + (4 << 20), 32 << 20),
                         64 << 20))
    flops = 2 * (N * M * GC + T * N * G
                 + L * (E * N * GC + E * GC * GC + N * E * GC + 2 * N * GC * G))
    cost = pl.CostEstimate(flops=flops,
                           transcendentals=N * G * (L + 1),
                           bytes_accessed=resident + f32 * L * (E * N + N * E + N))

    res = pl.BlockSpec(memory_space=pltpu.MemorySpace.VMEM)  # whole-array, resident
    grid_spec = pltpu.PrefetchScalarGridSpec(
        num_scalar_prefetch=0,
        grid=(L,),
        in_specs=[res, res, res, res, res,                   # packed params / indicators
                  res, res, res,                             # onehot_x, leaf_mask, tree_mat
                  pl.BlockSpec((None, E, N), lambda l: (l, 0, 0)),   # gather_ch[l]
                  pl.BlockSpec((None, N, E), lambda l: (l, 0, 0)),   # scatter_pa[l]
                  pl.BlockSpec((None, N, 1), lambda l: (l, 0, 0))],  # upd_mask[l]
        out_specs=pl.BlockSpec((T, G), lambda l: (0, 0)),
        scratch_shapes=[pltpu.VMEM((N, GC), jnp.float32),    # beta    (persistent)
                        pltpu.VMEM((N, G), jnp.float32),     # log-lik (persistent)
                        pltpu.VMEM((N, GC), jnp.float32)])   # emission b(x) (persistent)

    return pl.pallas_call(
        _uni_bhtmm_kernel,
        out_shape=jax.ShapeDtypeStruct((T, G), jnp.float32),
        grid_spec=grid_spec,
        compiler_params=pltpu.CompilerParams(
            dimension_semantics=("arbitrary",),              # strict bottom-up recursion
            vmem_limit_bytes=vmem_limit),
        cost_estimate=cost,
    )(b_all, pi_all, a_blk, sum_mat, exp_mat,
      onehot_x, leaf_mask, tree_mat,
      gather_ch, scatter_pa, upd_mask)


def build_dense_structure(x, tree, M):
    """Host-side glue: turn the data-dependent tree description into dense
    one-hot gather / scatter-mean matrices the kernel consumes as matmuls."""
    x = np.asarray(x)
    n = int(tree['dim'])
    inv_map = np.asarray(tree['inv_map'])
    leaves = np.asarray(tree['leaves'])
    trees_ind = np.asarray(tree['trees_ind'])
    levels_rev = list(reversed(tree['levels']))              # bottom-up order
    assert len(levels_rev) >= 1, "forest must have at least one level"

    n_trees = int(trees_ind.max()) + 1
    n_levels = len(levels_rev)
    max_e = max(len(p) for p, _ in levels_rev)

    onehot_x = np.zeros((n, M), np.float32)
    onehot_x[np.arange(n), x[inv_map]] = 1.0

    leaf_mask = np.zeros((n, 1), np.float32)
    leaf_mask[leaves, 0] = 1.0

    gather_ch = np.zeros((n_levels, max_e, n), np.float32)
    scatter_pa = np.zeros((n_levels, n, max_e), np.float32)
    upd_mask = np.zeros((n_levels, n, 1), np.float32)

    finalized = np.zeros(n, dtype=bool)                      # correctness checks
    finalized[leaves] = True
    for li, (par, ch) in enumerate(levels_rev):
        par = np.asarray(par)
        ch = np.asarray(ch)
        assert finalized[ch].all(), "levels must be strictly bottom-up"
        deg = np.bincount(par, minlength=n)
        for e, (p, c) in enumerate(zip(par, ch)):
            gather_ch[li, e, c] = 1.0
            scatter_pa[li, p, e] = 1.0 / deg[p]
            upd_mask[li, p, 0] = 1.0
        finalized[par] = True
    assert finalized[np.asarray(tree['roots'])].all(), "roots never finalized"

    tree_mat = np.zeros((n_trees, n), np.float32)
    tree_mat[trees_ind, np.arange(n)] = 1.0

    return tuple(jnp.asarray(a) for a in
                 (onehot_x, leaf_mask, gather_ch, scatter_pa, upd_mask, tree_mat))


class UniformBottomUpHTMM:
    """JAX/Pallas port of UniformBottomUpHTMM (forward only)."""

    def __init__(self, n_gen, C, M, key):
        k_a, k_b, k_pi = jax.random.split(key, 3)
        # torch: nn.init.uniform_(torch.empty(...)) == U(0, 1)
        self.A = jax.random.uniform(k_a, (C, C, n_gen), jnp.float32)
        self.B = jax.random.uniform(k_b, (C, M, n_gen), jnp.float32)
        self.Pi = jax.random.uniform(k_pi, (C, n_gen), jnp.float32)
        self.n_gen, self.C, self.M = n_gen, C, M
        self._fwd = jax.jit(uni_bhtmm_forward)

    def __call__(self, x, tree):
        dense = build_dense_structure(x, tree, self.M)
        return self._fwd(self.A, self.B, self.Pi, *dense)


def reference_forward(x, lam_A, lam_B, lam_Pi, tree):
    """Pure numpy (float64) reference mirroring ReversedUpwardDownward.forward."""
    def softmax(z, axis):
        z = z - z.max(axis=axis, keepdims=True)
        e = np.exp(z)
        return e / e.sum(axis=axis, keepdims=True)

    A = softmax(np.asarray(lam_A, np.float64), 0)    # [C, C, G]
    B = softmax(np.asarray(lam_B, np.float64), 1)    # [C, M, G]
    Pi = softmax(np.asarray(lam_Pi, np.float64), 0)  # [C, G]
    C, _, G = A.shape
    x = np.asarray(x)
    n = int(tree['dim'])
    inv_map = np.asarray(tree['inv_map'])
    leaves = np.asarray(tree['leaves'])
    trees_ind = np.asarray(tree['trees_ind'])

    beta = np.zeros((n, C, G))
    ll = np.zeros((n, G))

    B_leaves = B[:, x[inv_map[leaves]], :].transpose(1, 0, 2)    # [nl, C, G]
    beta_leaves = Pi[None] * B_leaves
    nu = beta_leaves.sum(1)
    beta[leaves] = beta_leaves / nu[:, None, :]
    ll[leaves] = np.log(nu)

    for par, ch in reversed(tree['levels']):
        par = np.asarray(par)
        ch = np.asarray(ch)
        beta_ch = beta[ch]                                       # [E, C, G]
        t_beta_ch = np.einsum('ijg,ejg->eig', A, beta_ch)
        u = np.unique(par)
        t_beta_u = np.stack([t_beta_ch[par == p].mean(0) for p in u])
        B_u = B[:, x[inv_map[u]], :].transpose(1, 0, 2)
        beta_u = B_u * t_beta_u
        nu = beta_u.sum(1)
        beta[u] = beta_u / nu[:, None, :]
        ll[u] = np.log(nu)

    n_trees = int(trees_ind.max()) + 1
    out = np.zeros((n_trees, G))
    np.add.at(out, trees_ind, ll)
    return out


if __name__ == "__main__":
    n_gen, C, M = 4, 4, 8

    # synthetic forest: two complete binary trees of depth 3 (7 nodes each)
    levels = [
        (np.array([0, 0, 7, 7]), np.array([1, 2, 8, 9])),                      # depth 0 -> 1
        (np.array([1, 1, 2, 2, 8, 8, 9, 9]),
         np.array([3, 4, 5, 6, 10, 11, 12, 13])),                              # depth 1 -> 2
    ]
    tree = {
        'dim': 14,
        'levels': levels,
        'leaves': np.array([3, 4, 5, 6, 10, 11, 12, 13]),
        'roots': np.array([0, 7]),
        'inv_map': np.arange(14),
        'trees_ind': np.array([0] * 7 + [1] * 7),
    }

    key = jax.random.PRNGKey(0)
    k_mod, k_x = jax.random.split(key)
    model = UniformBottomUpHTMM(n_gen, C, M, k_mod)
    x = np.asarray(jax.random.randint(k_x, (tree['dim'],), 0, M))

    out = model(x, tree)
    out = jax.block_until_ready(out)

    ref = reference_forward(x, np.asarray(model.A), np.asarray(model.B),
                            np.asarray(model.Pi), tree)
    # HIGHEST-precision propagation matmuls -> tight tolerance now holds
    if not np.allclose(np.asarray(out), ref, rtol=1e-3, atol=1e-3):
        raise AssertionError(f"mismatch:\nkernel=\n{np.asarray(out)}\nref=\n{ref}")
    print("KERNEL_OK")
</pallas_src>

<mosaic_0001>
module attributes {stable_mosaic.version = 11 : i64} {
  func.func @_uni_bhtmm_kernel(%arg0: i32, %arg1: memref<8x16xf32, #tpu.memory_space<vmem>>, %arg2: memref<1x16xf32, #tpu.memory_space<vmem>>, %arg3: memref<16x16xf32, #tpu.memory_space<vmem>>, %arg4: memref<16x4xf32, #tpu.memory_space<vmem>>, %arg5: memref<4x16xf32, #tpu.memory_space<vmem>>, %arg6: memref<14x8xf32, #tpu.memory_space<vmem>>, %arg7: memref<14x1xf32, #tpu.memory_space<vmem>>, %arg8: memref<2x14xf32, #tpu.memory_space<vmem>>, %arg9: memref<1x8x14xf32, #tpu.memory_space<vmem>>, %arg10: memref<1x14x8xf32, #tpu.memory_space<vmem>>, %arg11: memref<1x14x1xf32, #tpu.memory_space<vmem>>, %arg12: memref<2x4xf32, #tpu.memory_space<vmem>>, %arg13: memref<14x16xf32, #tpu.memory_space<vmem>>, %arg14: memref<14x4xf32, #tpu.memory_space<vmem>>, %arg15: memref<14x16xf32, #tpu.memory_space<vmem>>) attributes {dimension_semantics = [#tpu.dimension_semantics<arbitrary>], iteration_bounds = array<i64: 2>, scalar_prefetch = 0 : i64, scratch_operands = 3 : i64, tpu.core_type = #tpu.core_type<tc>, window_params = [{pipeline_mode = #tpu.pipeline_mode<synchronous>, transform_indices = @transform_0, window_bounds = array<i64: 8, 16>}, {pipeline_mode = #tpu.pipeline_mode<synchronous>, transform_indices = @transform_1, window_bounds = array<i64: 1, 16>}, {pipeline_mode = #tpu.pipeline_mode<synchronous>, transform_indices = @transform_2, window_bounds = array<i64: 16, 16>}, {pipeline_mode = #tpu.pipeline_mode<synchronous>, transform_indices = @transform_3, window_bounds = array<i64: 16, 4>}, {pipeline_mode = #tpu.pipeline_mode<synchronous>, transform_indices = @transform_4, window_bounds = array<i64: 4, 16>}, {pipeline_mode = #tpu.pipeline_mode<synchronous>, transform_indices = @transform_5, window_bounds = array<i64: 14, 8>}, {pipeline_mode = #tpu.pipeline_mode<synchronous>, transform_indices = @transform_6, window_bounds = array<i64: 14, 1>}, {pipeline_mode = #tpu.pipeline_mode<synchronous>, transform_indices = @transform_7, window_bounds = array<i64: 2, 14>}, {transform_indices = @transform_8, window_bounds = array<i64: 1, 8, 14>}, {transform_indices = @transform_9, window_bounds = array<i64: 1, 14, 8>}, {transform_indices = @transform_10, window_bounds = array<i64: 1, 14, 1>}, {pipeline_mode = #tpu.pipeline_mode<synchronous>, transform_indices = @transform_11, window_bounds = array<i64: 2, 4>}]} {
    %c0_i32 = arith.constant 0 : i32
    %0 = arith.cmpi eq, %arg0, %c0_i32 : i32
    %1 = arith.extui %0 : i1 to i32
    %c0_i32_0 = arith.constant 0 : i32
    %2 = arith.cmpi ne, %1, %c0_i32_0 : i32
    scf.if %2 {
      %c0_36 = arith.constant 0 : index
      %c0_37 = arith.constant 0 : index
      %51 = vector.load %arg6[%c0_36, %c0_37] : memref<14x8xf32, #tpu.memory_space<vmem>>, vector<14x8xf32>
      %c0_38 = arith.constant 0 : index
      %c0_39 = arith.constant 0 : index
      %52 = vector.load %arg1[%c0_38, %c0_39] : memref<8x16xf32, #tpu.memory_space<vmem>>, vector<8x16xf32>
      %cst_40 = arith.constant dense<0.000000e+00> : vector<14x16xf32>
      %53 = tpu.matmul %51, %52, %cst_40 {dimension_numbers = #tpu.dot_dimension_numbers<[1], [0], [0], [1], [0, 0, 1, 1], [], []>, precision = #tpu.contract_precision<fp32>} : vector<14x8xf32>, vector<8x16xf32>, vector<14x16xf32> -> vector<14x16xf32>
      %c0_41 = arith.constant 0 : index
      %c0_42 = arith.constant 0 : index
      %54 = vector.load %arg15[%c0_41, %c0_42] : memref<14x16xf32, #tpu.memory_space<vmem>>, vector<14x16xf32>
      tpu.vector_store %arg15[%c0_41, %c0_42], %53 {strides = array<i32>} : memref<14x16xf32, #tpu.memory_space<vmem>>, vector<14x16xf32>,
      %c0_43 = arith.constant 0 : index
      %c0_44 = arith.constant 0 : index
      %55 = vector.load %arg7[%c0_43, %c0_44] : memref<14x1xf32, #tpu.memory_space<vmem>>, vector<14x1xf32>
      %c0_45 = arith.constant 0 : index
      %c0_46 = arith.constant 0 : index
      %56 = vector.load %arg2[%c0_45, %c0_46] : memref<1x16xf32, #tpu.memory_space<vmem>>, vector<1x16xf32>
      %57 = vector.broadcast %56 : vector<1x16xf32> to vector<14x16xf32>
      %58 = arith.mulf %57, %53 : vector<14x16xf32>
      %c0_47 = arith.constant 0 : index
      %c0_48 = arith.constant 0 : index
      %59 = vector.load %arg4[%c0_47, %c0_48] : memref<16x4xf32, #tpu.memory_space<vmem>>, vector<16x4xf32>
      %cst_49 = arith.constant dense<0.000000e+00> : vector<14x4xf32>
      %60 = tpu.matmul %58, %59, %cst_49 {dimension_numbers = #tpu.dot_dimension_numbers<[1], [0], [0], [1], [0, 0, 1, 1], [], []>, precision = #tpu.contract_precision<fp32>} : vector<14x16xf32>, vector<16x4xf32>, vector<14x4xf32> -> vector<14x4xf32>
      %61 = vector.broadcast %55 : vector<14x1xf32> to vector<14x4xf32>
      %62 = arith.mulf %61, %60 : vector<14x4xf32>
      %cst_50 = arith.constant 1.000000e+00 : f32
      %63 = vector.broadcast %cst_50 : f32 to vector<14x1xf32>
      %64 = arith.subf %63, %55 : vector<14x1xf32>
      %65 = vector.broadcast %64 : vector<14x1xf32> to vector<14x4xf32>
      %66 = arith.addf %62, %65 : vector<14x4xf32>
      %cst_51 = arith.constant 1.000000e+00 : f32
      %67 = vector.broadcast %cst_51 : f32 to vector<14x4xf32>
      %68 = arith.divf %67, %66 : vector<14x4xf32>
      %c0_52 = arith.constant 0 : index
      %c0_53 = arith.constant 0 : index
      %69 = vector.load %arg5[%c0_52, %c0_53] : memref<4x16xf32, #tpu.memory_space<vmem>>, vector<4x16xf32>
      %cst_54 = arith.constant dense<0.000000e+00> : vector<14x16xf32>
      %70 = tpu.matmul %68, %69, %cst_54 {dimension_numbers = #tpu.dot_dimension_numbers<[1], [0], [0], [1], [0, 0, 1, 1], [], []>, precision = #tpu.contract_precision<fp32>} : vector<14x4xf32>, vector<4x16xf32>, vector<14x16xf32> -> vector<14x16xf32>
      %71 = arith.mulf %58, %70 : vector<14x16xf32>
      %72 = vector.broadcast %55 : vector<14x1xf32> to vector<14x16xf32>
      %73 = arith.mulf %72, %71 : vector<14x16xf32>
      %c0_55 = arith.constant 0 : index
      %c0_56 = arith.constant 0 : index
      %74 = vector.load %arg13[%c0_55, %c0_56] : memref<14x16xf32, #tpu.memory_space<vmem>>, vector<14x16xf32>
      tpu.vector_store %arg13[%c0_55, %c0_56], %73 {strides = array<i32>} : memref<14x16xf32, #tpu.memory_space<vmem>>, vector<14x16xf32>,
      %75 = math.log %66 : vector<14x4xf32>
      %76 = vector.broadcast %55 : vector<14x1xf32> to vector<14x4xf32>
      %77 = arith.mulf %76, %75 : vector<14x4xf32>
      %c0_57 = arith.constant 0 : index
      %c0_58 = arith.constant 0 : index
      %78 = vector.load %arg14[%c0_57, %c0_58] : memref<14x4xf32, #tpu.memory_space<vmem>>, vector<14x4xf32>
      tpu.vector_store %arg14[%c0_57, %c0_58], %77 {strides = array<i32>} : memref<14x4xf32, #tpu.memory_space<vmem>>, vector<14x4xf32>,
    } else {
    }
    %c0 = arith.constant 0 : index
    %c0_1 = arith.constant 0 : index
    %c0_2 = arith.constant 0 : index
    %3 = vector.load %arg9[%c0, %c0_1, %c0_2] : memref<1x8x14xf32, #tpu.memory_space<vmem>>, vector<1x8x14xf32>
    %4 = vector.shape_cast %3 : vector<1x8x14xf32> to vector<8x14xf32>
    %c0_3 = arith.constant 0 : index
    %c0_4 = arith.constant 0 : index
    %5 = vector.load %arg13[%c0_3, %c0_4] : memref<14x16xf32, #tpu.memory_space<vmem>>, vector<14x16xf32>
    %cst = arith.constant dense<0.000000e+00> : vector<8x16xf32>
    %6 = tpu.matmul %4, %5, %cst {dimension_numbers = #tpu.dot_dimension_numbers<[1], [0], [0], [1], [0, 0, 1, 1], [], []>, precision = #tpu.contract_precision<fp32>} : vector<8x14xf32>, vector<14x16xf32>, vector<8x16xf32> -> vector<8x16xf32>
    %c0_5 = arith.constant 0 : index
    %c0_6 = arith.constant 0 : index
    %7 = vector.load %arg3[%c0_5, %c0_6] : memref<16x16xf32, #tpu.memory_space<vmem>>, vector<16x16xf32>
    %cst_7 = arith.constant dense<0.000000e+00> : vector<8x16xf32>
    %8 = tpu.matmul %6, %7, %cst_7 {dimension_numbers = #tpu.dot_dimension_numbers<[1], [0], [0], [1], [0, 0, 1, 1], [], []>, precision = #tpu.contract_precision<fp32>} : vector<8x16xf32>, vector<16x16xf32>, vector<8x16xf32> -> vector<8x16xf32>
    %c0_8 = arith.constant 0 : index
    %c0_9 = arith.constant 0 : index
    %c0_10 = arith.constant 0 : index
    %9 = vector.load %arg10[%c0_8, %c0_9, %c0_10] : memref<1x14x8xf32, #tpu.memory_space<vmem>>, vector<1x14x8xf32>
    %10 = vector.shape_cast %9 : vector<1x14x8xf32> to vector<14x8xf32>
    %cst_11 = arith.constant dense<0.000000e+00> : vector<14x16xf32>
    %11 = tpu.matmul %10, %8, %cst_11 {dimension_numbers = #tpu.dot_dimension_numbers<[1], [0], [0], [1], [0, 0, 1, 1], [], []>, precision = #tpu.contract_precision<fp32>} : vector<14x8xf32>, vector<8x16xf32>, vector<14x16xf32> -> vector<14x16xf32>
    %c0_12 = arith.constant 0 : index
    %c0_13 = arith.constant 0 : index
    %c0_14 = arith.constant 0 : index
    %12 = vector.load %arg11[%c0_12, %c0_13, %c0_14] : memref<1x14x1xf32, #tpu.memory_space<vmem>>, vector<1x14x1xf32>
    %13 = vector.shape_cast %12 : vector<1x14x1xf32> to vector<14x1xf32>
    %c0_15 = arith.constant 0 : index
    %c0_16 = arith.constant 0 : index
    %14 = vector.load %arg15[%c0_15, %c0_16] : memref<14x16xf32, #tpu.memory_space<vmem>>, vector<14x16xf32>
    %15 = arith.mulf %14, %11 : vector<14x16xf32>
    %c0_17 = arith.constant 0 : index
    %c0_18 = arith.constant 0 : index
    %16 = vector.load %arg4[%c0_17, %c0_18] : memref<16x4xf32, #tpu.memory_space<vmem>>, vector<16x4xf32>
    %cst_19 = arith.constant dense<0.000000e+00> : vector<14x4xf32>
    %17 = tpu.matmul %15, %16, %cst_19 {dimension_numbers = #tpu.dot_dimension_numbers<[1], [0], [0], [1], [0, 0, 1, 1], [], []>, precision = #tpu.contract_precision<fp32>} : vector<14x16xf32>, vector<16x4xf32>, vector<14x4xf32> -> vector<14x4xf32>
    %18 = vector.broadcast %13 : vector<14x1xf32> to vector<14x4xf32>
    %19 = arith.mulf %18, %17 : vector<14x4xf32>
    %cst_20 = arith.constant 1.000000e+00 : f32
    %20 = vector.broadcast %cst_20 : f32 to vector<14x1xf32>
    %21 = arith.subf %20, %13 : vector<14x1xf32>
    %22 = vector.broadcast %21 : vector<14x1xf32> to vector<14x4xf32>
    %23 = arith.addf %19, %22 : vector<14x4xf32>
    %cst_21 = arith.constant 1.000000e+00 : f32
    %24 = vector.broadcast %cst_21 : f32 to vector<14x4xf32>
    %25 = arith.divf %24, %23 : vector<14x4xf32>
    %c0_22 = arith.constant 0 : index
    %c0_23 = arith.constant 0 : index
    %26 = vector.load %arg5[%c0_22, %c0_23] : memref<4x16xf32, #tpu.memory_space<vmem>>, vector<4x16xf32>
    %cst_24 = arith.constant dense<0.000000e+00> : vector<14x16xf32>
    %27 = tpu.matmul %25, %26, %cst_24 {dimension_numbers = #tpu.dot_dimension_numbers<[1], [0], [0], [1], [0, 0, 1, 1], [], []>, precision = #tpu.contract_precision<fp32>} : vector<14x4xf32>, vector<4x16xf32>, vector<14x16xf32> -> vector<14x16xf32>
    %28 = arith.mulf %15, %27 : vector<14x16xf32>
    %29 = vector.broadcast %13 : vector<14x1xf32> to vector<14x16xf32>
    %30 = arith.mulf %29, %28 : vector<14x16xf32>
    %cst_25 = arith.constant 1.000000e+00 : f32
    %31 = vector.broadcast %cst_25 : f32 to vector<14x1xf32>
    %32 = arith.subf %31, %13 : vector<14x1xf32>
    %c0_26 = arith.constant 0 : index
    %c0_27 = arith.constant 0 : index
    %33 = vector.load %arg13[%c0_26, %c0_27] : memref<14x16xf32, #tpu.memory_space<vmem>>, vector<14x16xf32>
    %34 = vector.broadcast %32 : vector<14x1xf32> to vector<14x16xf32>
    %35 = arith.mulf %34, %33 : vector<14x16xf32>
    %36 = arith.addf %30, %35 : vector<14x16xf32>
    %c0_28 = arith.constant 0 : index
    %c0_29 = arith.constant 0 : index
    %37 = vector.load %arg13[%c0_28, %c0_29] : memref<14x16xf32, #tpu.memory_space<vmem>>, vector<14x16xf32>
    tpu.vector_store %arg13[%c0_28, %c0_29], %36 {strides = array<i32>} : memref<14x16xf32, #tpu.memory_space<vmem>>, vector<14x16xf32>,
    %38 = math.log %23 : vector<14x4xf32>
    %39 = vector.broadcast %13 : vector<14x1xf32> to vector<14x4xf32>
    %40 = arith.mulf %39, %38 : vector<14x4xf32>
    %cst_30 = arith.constant 1.000000e+00 : f32
    %41 = vector.broadcast %cst_30 : f32 to vector<14x1xf32>
    %42 = arith.subf %41, %13 : vector<14x1xf32>
    %c0_31 = arith.constant 0 : index
    %c0_32 = arith.constant 0 : index
    %43 = vector.load %arg14[%c0_31, %c0_32] : memref<14x4xf32, #tpu.memory_space<vmem>>, vector<14x4xf32>
    %44 = vector.broadcast %42 : vector<14x1xf32> to vector<14x4xf32>
    %45 = arith.mulf %44, %43 : vector<14x4xf32>
    %46 = arith.addf %40, %45 : vector<14x4xf32>
    %c0_33 = arith.constant 0 : index
    %c0_34 = arith.constant 0 : index
    %47 = vector.load %arg14[%c0_33, %c0_34] : memref<14x4xf32, #tpu.memory_space<vmem>>, vector<14x4xf32>
    tpu.vector_store %arg14[%c0_33, %c0_34], %46 {strides = array<i32>} : memref<14x4xf32, #tpu.memory_space<vmem>>, vector<14x4xf32>,
    %c1_i32 = arith.constant 1 : i32
    %48 = arith.cmpi eq, %arg0, %c1_i32 : i32
    %49 = arith.extui %48 : i1 to i32
    %c0_i32_35 = arith.constant 0 : i32
    %50 = arith.cmpi ne, %49, %c0_i32_35 : i32
    scf.if %50 {
      %c0_36 = arith.constant 0 : index
      %c0_37 = arith.constant 0 : index
      %51 = vector.load %arg8[%c0_36, %c0_37] : memref<2x14xf32, #tpu.memory_space<vmem>>, vector<2x14xf32>
      %c0_38 = arith.constant 0 : index
      %c0_39 = arith.constant 0 : index
      %52 = vector.load %arg14[%c0_38, %c0_39] : memref<14x4xf32, #tpu.memory_space<vmem>>, vector<14x4xf32>
      %cst_40 = arith.constant dense<0.000000e+00> : vector<2x4xf32>
      %53 = tpu.matmul %51, %52, %cst_40 {dimension_numbers = #tpu.dot_dimension_numbers<[1], [0], [0], [1], [0, 0, 1, 1], [], []>, precision = #tpu.contract_precision<fp32>} : vector<2x14xf32>, vector<14x4xf32>, vector<2x4xf32> -> vector<2x4xf32>
      %c0_41 = arith.constant 0 : index
      %c0_42 = arith.constant 0 : index
      %54 = vector.load %arg12[%c0_41, %c0_42] : memref<2x4xf32, #tpu.memory_space<vmem>>, vector<2x4xf32>
      tpu.vector_store %arg12[%c0_41, %c0_42], %53 {strides = array<i32>} : memref<2x4xf32, #tpu.memory_space<vmem>>, vector<2x4xf32>,
    } else {
    }
    return
  }
  func.func @transform_0(%arg0: i32) -> (i32, i32) {
    %c0_i32 = arith.constant 0 : i32
    %c0_i32_0 = arith.constant 0 : i32
    %c0_i32_1 = arith.constant 0 : i32
    return %c0_i32, %c0_i32_0 : i32, i32
  }
  func.func @transform_1(%arg0: i32) -> (i32, i32) {
    %c0_i32 = arith.constant 0 : i32
    %c0_i32_0 = arith.constant 0 : i32
    %c0_i32_1 = arith.constant 0 : i32
    return %c0_i32, %c0_i32_0 : i32, i32
  }
  func.func @transform_2(%arg0: i32) -> (i32, i32) {
    %c0_i32 = arith.constant 0 : i32
    %c0_i32_0 = arith.constant 0 : i32
    %c0_i32_1 = arith.constant 0 : i32
    return %c0_i32, %c0_i32_0 : i32, i32
  }
  func.func @transform_3(%arg0: i32) -> (i32, i32) {
    %c0_i32 = arith.constant 0 : i32
    %c0_i32_0 = arith.constant 0 : i32
    %c0_i32_1 = arith.constant 0 : i32
    return %c0_i32, %c0_i32_0 : i32, i32
  }
  func.func @transform_4(%arg0: i32) -> (i32, i32) {
    %c0_i32 = arith.constant 0 : i32
    %c0_i32_0 = arith.constant 0 : i32
    %c0_i32_1 = arith.constant 0 : i32
    return %c0_i32, %c0_i32_0 : i32, i32
  }
  func.func @transform_5(%arg0: i32) -> (i32, i32) {
    %c0_i32 = arith.constant 0 : i32
    %c0_i32_0 = arith.constant 0 : i32
    %c0_i32_1 = arith.constant 0 : i32
    return %c0_i32, %c0_i32_0 : i32, i32
  }
  func.func @transform_6(%arg0: i32) -> (i32, i32) {
    %c0_i32 = arith.constant 0 : i32
    %c0_i32_0 = arith.constant 0 : i32
    %c0_i32_1 = arith.constant 0 : i32
    return %c0_i32, %c0_i32_0 : i32, i32
  }
  func.func @transform_7(%arg0: i32) -> (i32, i32) {
    %c0_i32 = arith.constant 0 : i32
    %c0_i32_0 = arith.constant 0 : i32
    %c0_i32_1 = arith.constant 0 : i32
    return %c0_i32, %c0_i32_0 : i32, i32
  }
  func.func @transform_8(%arg0: i32) -> (i32, i32, i32) {
    %c0_i32 = arith.constant 0 : i32
    %c0_i32_0 = arith.constant 0 : i32
    %c0_i32_1 = arith.constant 0 : i32
    return %arg0, %c0_i32, %c0_i32_0 : i32, i32, i32
  }
  func.func @transform_9(%arg0: i32) -> (i32, i32, i32) {
    %c0_i32 = arith.constant 0 : i32
    %c0_i32_0 = arith.constant 0 : i32
    %c0_i32_1 = arith.constant 0 : i32
    return %arg0, %c0_i32, %c0_i32_0 : i32, i32, i32
  }
  func.func @transform_10(%arg0: i32) -> (i32, i32, i32) {
    %c0_i32 = arith.constant 0 : i32
    %c0_i32_0 = arith.constant 0 : i32
    %c0_i32_1 = arith.constant 0 : i32
    return %arg0, %c0_i32, %c0_i32_0 : i32, i32, i32
  }
  func.func @transform_11(%arg0: i32) -> (i32, i32) {
    %c0_i32 = arith.constant 0 : i32
    %c0_i32_0 = arith.constant 0 : i32
    %c0_i32_1 = arith.constant 0 : i32
    return %c0_i32, %c0_i32_0 : i32, i32
  }
}

</mosaic_0001>

<bundles_post_ra>
// kernel: uni_bhtmm_forward.1
= control target key start
LH: loop header
LB: loop body
LE: loop exit
PB: predicated region body
PF: predicated region fallthrough
CT: control target
= control target key end

     0   :  { %16 = vsyncpa [#allocation6], 0  ;;  %s5896_s17 = smov 0   ;;  %s6134_s0 = inlined_call_operand.vmem [shape: f32[8,16], index: 0, kind: input, shape index: {}]   ;;  %s6135_s1 = inlined_call_operand.vmem [shape: f32[1,16], index: 1, kind: input, shape index: {}]   ;;  %s6136_s2 = inlined_call_operand.vmem [shape: f32[16,16], index: 2, kind: input, shape index: {}]   ;;  %s6137_s3 = inlined_call_operand.vmem [shape: f32[16,4], index: 3, kind: input, shape index: {}]   ;;  %s6138_s4 = inlined_call_operand.vmem [shape: f32[4,16], index: 4, kind: input, shape index: {}]   ;;  %s6139_s5 = inlined_call_operand.vmem [shape: f32[14,8], index: 5, kind: input, shape index: {}]   ;;  %s6140_s6 = inlined_call_operand.vmem [shape: f32[14,1], index: 6, kind: input, shape index: {}]   ;;  %s6141_s7 = inlined_call_operand.vmem [shape: f32[2,14], index: 7, kind: input, shape index: {}]   ;;  %s6142_s8 = inlined_call_operand.vmem [shape: f32[2,8,14], index: 8, kind: input, shape index: {}]   ;;  %s6143_s9 = inlined_call_operand.vmem [shape: f32[2,14,8], index: 9, kind: input, shape index: {}]   ;;  %s6144_s10 = inlined_call_operand.vmem [shape: f32[2,14,1], index: 10, kind: input, shape index: {}]   ;;  %s6145_s11 = inlined_call_operand.hbm [shape: f32[2,4], index: 11, kind: output, shape index: {}]  }
   0x1 LB: > { %s5902_s18 = sadd.s32 4294967295, %s5825_s17   ;;  %p5037_p0 = scmp.ge.s32.totalorder %s5825_s17, 1  ;;  %s5825_s17 = sphi %s5896_s17, %s22_s17  }
   0x2   : > { %p352_p1 = scmp.lt.s32.totalorder %s5825_s17, 3 }
   0x4   : > { %p353_p2 = pnand %p5037_p0, %p352_p1 }
   0x5   : > { %p396_p3 = scmp.lt.s32.totalorder (!%p353_p2), %s5902_s18, 1  ;;  %p5043_p4 = scmp.ne.s32.totalorder (!%p353_p2), %s5902_s18, 0 }
   0x6   : > { %356 = sbr.rel (%p353_p2) target bundleno = 2388 (0x954), region = 64 }
   0xd   : > { %s397_s19 = scalar_select %p396_p3, %s5902_s18, 1 }
   0xe   : > { %413 = sbr.rel (%p5043_p4) target bundleno = 812 (0x32c), region = 68  ;;  %v416_v0 = vld [vmem:[%s6134_s0] sm:$0xff] (!%p5043_p4)  ;;  %v415_v2 = vld [vmem:[%s6139_s5 + $0x8] sm:$0x3f] (!%p5043_p4)  ;;  %vm417_vm0 = vcmask (!%p5043_p4), 64512   ;;  %v5827_v38 = vmov (!%p5043_p4), 0  }
   0xf   : > { %s5038_s20 = sshll.u32 %s397_s19, 3  ;;  %s5050_s21 = sshll.u32 %s397_s19, 4  ;;  %v414_v1 = vld [vmem:[%s6139_s5] sm:$0xff] (!%p5043_p4)  ;;  %v425_v3 = vand.u32 (!%p5043_p4), 4294901760, %v416_v0  ;;  %v422_v5 = vsel (!%p5043_p4), %vm417_vm0, %v415_v2, 0  ;;  %v929_v21 = vld [vmem:[%s6137_s3 + $0x8] sm:$0xff] (!%p5043_p4)  ;;  %5769 = vset.pattern.permute.xlu0 (!%p5043_p4), %v5827_v38  ;;  %5770 = vset.pattern.permute.xlu1 (!%p5043_p4), %v5827_v38 }
  0x10   : > { %s5911_s24 = scalar_lea.vmem %s6142_s8, %s5038_s20  ;;  %s5916_s27 = scalar_lea.vmem %s6143_s9, %s5050_s21  ;;  %v419_v4 = vsel (!%p5043_p4), %vm417_vm0, %v414_v1, 0  ;;  %v500_v7 = vand.u32 (!%p5043_p4), 4294901760, %v422_v5  ;;  %v928_v20 = vld [vmem:[%s6137_s3] sm:$0xff] (!%p5043_p4)  ;;  %v940_v23 = vand.u32 (!%p5043_p4), 4294901760, %v929_v21  ;;  %v918_v37 = vld [vmem:[%s6140_s6 + $0x8] sm:$0x3f] (!%p5043_p4) }
  0x11   : > { %s5921_s30 = scalar_lea.vmem %s6144_s10, %s5050_s21  ;;  %v490_v6 = vand.u32 (!%p5043_p4), 4294901760, %v419_v4  ;;  %5241 = vmatprep.subr.mxu0 (!%p5043_p4), %v425_v3  ;;  %5226 = vmatprep.subr.mxu1 (!%p5043_p4), %v425_v3  ;;  %v512_v8 = vsub.f32 (!%p5043_p4), %v416_v0, %v425_v3  ;;  %v937_v22 = vand.u32 (!%p5043_p4), 4294901760, %v928_v20  ;;  %v917_v36 = vld [vmem:[%s6140_s6] sm:$0xff] (!%p5043_p4)  ;;  %v1451_v40 = vsub.f32 (!%p5043_p4), 1.0, %v918_v37 }
  0x12   : > { %5242 = vmatpush3.msra.mxu0 (!%p5043_p4), %v425_v3  ;;  %v501_v10 = vsub.f32 (!%p5043_p4), %v422_v5, %v500_v7  ;;  %5227 = vmatpush3.msra.mxu1 (!%p5043_p4), %v425_v3  ;;  %v1032_v26 = vsub.f32 (!%p5043_p4), %v929_v21, %v940_v23  ;;  %v1450_v39 = vsub.f32 (!%p5043_p4), 1.0, %v917_v36  ;;  %vm915_vm1 = vcmask (!%p5043_p4), 128000   ;;  %v5044_v44 = vld [vmem:[%s6135_s1] ss:$0 sm:$0xff] (!%p5043_p4) }
  0x13   : > { %v491_v9 = vsub.f32 (!%p5043_p4), %v419_v4, %v490_v6  ;;  %v513_v11 = vand.u32 (!%p5043_p4), 4294901760, %v512_v8  ;;  %v5939_v24 = vpack.c.bf16 (!%p5043_p4), %v940_v23, %v937_v22  ;;  %v1025_v25 = vsub.f32 (!%p5043_p4), %v928_v20, %v937_v22  ;;  %1440 = vperm.xlu0 (!%p5043_p4), %5769, %v917_v36   ;;  %v1468_v62 = vld [vmem:[%s6138_s4] sm:$0xf] (!%p5043_p4) }
  0x14   : > { %v502_v13 = vand.u32 (!%p5043_p4), 4294901760, %v501_v10  ;;  %v1033_v28 = vand.u32 (!%p5043_p4), 4294901760, %v1032_v26  ;;  %1454 = vperm.xlu1 (!%p5043_p4), %5770, %v1450_v39   ;;  %vm913_vm2 = vcmask (!%p5043_p4), 130048   ;;  %vm1476_vm3 = vcmask (!%p5043_p4), 1043456  }
  0x15   : > { %v492_v12 = vand.u32 4294901760, %v491_v9  ;;  %v514_v14 = vsub.f32 %v512_v8, %v513_v11  ;;  %5246 = vmatprep.subr.mxu0 %v513_v11  ;;  %v1026_v27 = vand.u32 4294901760, %v1025_v25  ;;  %v5564_v33 = vpack.c.bf16 %v1032_v26, %v1025_v25 }
  0x16   : > { %v503_v16 = vsub.f32 %v501_v10, %v502_v13  ;;  %v1034_v30 = vsub.f32 %v1032_v26, %v1033_v28  ;;  %v1478_v63 = vsel %vm1476_vm3, %v1468_v62, 0  ;;  %vm1469_vm4 = vcmask 31744  }
  0x17   : > { %5243 = vmatprep.mubr.f32.mxu0 %v492_v12  ;;  %v493_v15 = vsub.f32 %v491_v9, %v492_v12  ;;  %v515_v17 = vand.u32 4294901760, %v514_v14  ;;  %v1027_v29 = vsub.f32 %v1025_v25, %v1026_v27  ;;  %v5572_v35 = vpack.c.bf16 %v1033_v28, %v1026_v27  ;;  %1445 = vperm.xlu0 %5769, %v918_v37  }
  0x18   : > { %5244 = vmatmul.mubr.f32.vlgmr.msra.gmra.mrb[0].mxu0 %v502_v13  ;;  %v504_v19 = vand.u32 4294901760, %v503_v16  ;;  %v1035_v32 = vand.u32 4294901760, %v1034_v30  ;;  %1459 = vperm.xlu1 %5770, %v1451_v40   ;;  %v5969_v0 = vand.u32 4294901760, %v1478_v63  ;;  %vm1982_vm5 = vcmask 29696  }
  0x19   : > { %v494_v18 = vand.u32 4294901760, %v493_v15  ;;  %5247 = vmatpush3.msra.mxu0 %v513_v11  ;;  %5248 = vmatprep.mubr.f32.mxu0 %v490_v6  ;;  %v1028_v31 = vand.u32 4294901760, %v1027_v29 }
  0x1a   : > { %5231 = vmatprep.subr.mxu1 %v515_v17  ;;  %5251 = vmatprep.subr.mxu0 %v425_v3  ;;  %v1568_v1 = vsub.f32 %v1478_v63, %v5969_v0 }
  0x1b   : > { %5228 = vmatprep.mubr.f32.mxu1 %v494_v18  ;;  %v5560_v34 = vpack.c.bf16 %v1035_v32, %v1028_v31 }
  0x1c   : > { %5229 = vmatmul.mubr.f32.vlgmr.msra.gmra.mrb[0].mxu1 %v504_v19  ;;  %v1569_v2 = vand.u32 4294901760, %v1568_v1 }
  0x1d   : > { %5232 = vmatpush3.msra.mxu1 %v515_v17  ;;  %5233 = vmatprep.mubr.f32.mxu1 %v490_v6 }
  0x1e   : > { %5236 = vmatprep.subr.mxu1 %v512_v8 }
  0x20   : > { %5249 = vmatmul.mubr.f32.vlgmr.msra.gmra.mrb[0].mxu0 %v500_v7 }
  0x21   : > { %5252 = vmatpush3.msra.mxu0 %v425_v3  ;;  %5253 = vmatprep.mubr.f32.mxu0 %v490_v6  ;;  %v1570_v3 = vsub.f32 %v1568_v1, %v1569_v2 }
  0x22   : > { %5298 = vmatprep.subr.mxu0 %v5969_v0 }
  0x23   : > { %v1571_v4 = vand.u32 4294901760, %v1570_v3 }
  0x24   : > { %5234 = vmatmul.mubr.f32.vlgmr.msra.gmra.mrb[0].mxu1 %v500_v7 }
  0x25   : > { %5237 = vmatpush3.msra.mxu1 %v512_v8  ;;  %5238 = vmatprep.mubr.f32.mxu1 %v491_v9 }
  0x26   : > { %5557 = vmatprep.subr.bf16.mxu1 %v5939_v24 }
  0x28   : > { %5254 = vmatmul.mubr.f32.vlgmr.msra.gmra.mrb[0].mxu0 %v500_v7 }
  0x29   : > { %5299 = vmatpush3.msra.mxu0 %v5969_v0 }
  0x2a   : > { %5303 = vmatprep.subr.mxu0 %v1571_v4 }
  0x2c   : > { %5239 = vmatmul.mubr.f32.vlgmr.msra.gmra.mrb[0].mxu1 %v501_v10 }
  0x2d   : > { %5559 = vmatpush3.bf16.msra.mxu1 %v5939_v24 }
  0x2e   : > { %5561 = vmatprep.subr.bf16.mxu1 %v5560_v34 }
  0x92   : > { %v5974_v5 = vpop.permute.xlu0 %1440 }
  0x93   : > { %v1455_v6 = vpop.permute.xlu1 %1454 }
  0x96   : > { %v1446_v7 = vpop.permute.xlu0 %1445 }
  0x97   : > { %v1460_v11 = vpop.permute.xlu1 %1459 }
  0xfb   : > { %v5255_v41 = vpop.f32.mrb[0].mxu0 }
  0xfc   : > { %v903_v42 = vpop.f32.mrb[1].mxu0 }
  0xff   : > { %v5240_v43 = vpop.f32.mrb[0].mxu1 }
 0x100   : > { %v5658_v45 = vadd.f32 %v5255_v41, %v5240_v43  ;;  %v662_v46 = vpop.f32.mrb[1].mxu1 }
 0x101   : > { %v5659_v47 = vadd.f32 %v903_v42, %v662_v46 }
 0x102   : > { %916 = vst.msk [vmem:[#allocation4 + $0x8] sm:$0x3f] %vm915_vm1, %v5658_v45  ;;  %v5953_v48 = vmul.f32 %v5658_v45, %v5044_v44 }
 0x103   : > { %914 = vst.msk [vmem:[#allocation4] sm:$0xff] %vm913_vm2, %v5659_v47  ;;  %v5956_v49 = vmul.f32 %v5659_v47, %v5044_v44 }
 0x104   : > { %v934_v50 = vsel %vm913_vm2, %v5953_v48, 0 }
 0x105   : > { %v1013_v51 = vand.u32 4294901760, %v934_v50  ;;  %v931_v52 = vsel %vm913_vm2, %v5956_v49, 0 }
 0x106   : > { %v1003_v53 = vand.u32 4294901760, %v931_v52 }
 0x107   : > { %v1014_v54 = vsub.f32 %v934_v50, %v1013_v51 }
 0x108   : > { %v1004_v55 = vsub.f32 %v931_v52, %v1003_v53 }
 0x109   : > { %v1015_v56 = vand.u32 4294901760, %v1014_v54 }
 0x10a   : > { %v1005_v57 = vand.u32 4294901760, %v1004_v55 }
 0x10b   : > { %v1016_v58 = vsub.f32 %v1014_v54, %v1015_v56 }
 0x10c   : > { %v1006_v59 = vsub.f32 %v1004_v55, %v1005_v57 }
 0x10d   : > { %v1017_v61 = vand.u32 4294901760, %v1016_v58 }
 0x10e   : > { %v1007_v60 = vand.u32 4294901760, %v1006_v59 }
 0x110   : > { %5260 = vmatprep.mubr.f32.mxu1 %v1007_v60 }
 0x111   : > { %5261 = vmatmul.mubr.f32.vlgmr.msra.gmra.mrb[2].mxu1 %v1017_v61 }
 0x112   : > { %5563 = vmatpush3.bf16.msra.mxu1 %v5560_v34  ;;  %5267 = vmatprep.mubr.f32.mxu1 %v1003_v53 }
 0x113   : > { %5565 = vmatprep.subr.bf16.mxu1 %v5564_v33 }
 0x119   : > { %5268 = vmatmul.mubr.f32.vlgmr.msra.gmra.mrb[2].mxu1 %v1013_v51 }
 0x11a   : > { %5567 = vmatpush3.bf16.msra.mxu1 %v5564_v33  ;;  %5274 = vmatprep.mubr.f32.mxu1 %v1004_v55 }
 0x11b   : > { %5569 = vmatprep.subr.bf16.mxu1 %v5939_v24 }
 0x121   : > { %5275 = vmatmul.mubr.f32.vlgmr.msra.gmra.mrb[2].mxu1 %v1014_v54 }
 0x122   : > { %5571 = vmatpush3.bf16.msra.mxu1 %v5939_v24  ;;  %5281 = vmatprep.mubr.f32.mxu1 %v1005_v57 }
 0x123   : > { %5573 = vmatprep.subr.bf16.mxu1 %v5572_v35 }
 0x129   : > { %5282 = vmatmul.mubr.f32.vlgmr.msra.gmra.mrb[2].mxu1 %v1015_v56 }
 0x12a   : > { %5575 = vmatpush3.bf16.msra.mxu1 %v5572_v35  ;;  %5288 = vmatprep.mubr.f32.mxu1 %v1003_v53 }
 0x12b   : > { %5577 = vmatprep.subr.bf16.mxu1 %v5939_v24 }
 0x131   : > { %5289 = vmatmul.mubr.f32.vlgmr.msra.gmra.mrb[2].mxu1 %v1013_v51 }
 0x132   : > { %5579 = vmatpush3.bf16.msra.mxu1 %v5939_v24  ;;  %5295 = vmatprep.mubr.f32.mxu1 %v1003_v53 }
 0x139   : > { %5296 = vmatmul.mubr.f32.vlgmr.msra.gmra.mrb[2].mxu1 %v1013_v51 }
 0x20c   : > { %v5297_v8 = vpop.f32.mrb[2].mxu1 }
 0x20d   : > { %v1449_v9 = vmul.f32 %v5297_v8, %v1446_v7  ;;  %v1428_v10 = vpop.f32.mrb[3].mxu1 }
 0x20e   : > { %v1448_v12 = vmul.f32 %v5974_v5, %v1428_v10 }
 0x20f   : > { %v1463_v13 = vadd.f32 %v1460_v11, %v1449_v9 }
 0x210   : > { %v1462_v14 = vadd.f32 %v1455_v6, %v1448_v12 }
 0x211   : > { %5771 = vrcp.f32 %v1463_v13 }
 0x212   : > { %5773 = vlog2.f32 %v1463_v13 }
 0x213   : > { %5775 = vrcp.f32 %v1462_v14 }
 0x214   : > { %5777 = vlog2.f32 %v1462_v14 }
 0x21b   : > { %v5772_v15 = vpop.eup %5771 }
 0x21c   : > { %v5774_v16 = vpop.eup %5773  ;;  %v1474_v17 = vsel %vm1469_vm4, %v5772_v15, 0 }
 0x21d   : > { %v5776_v18 = vpop.eup %5775  ;;  %v1978_v19 = vmul.f32 0.6931472, %v5774_v16  ;;  %v1556_v20 = vand.u32 4294901760, %v1474_v17 }
 0x21e   : > { %v5778_v21 = vpop.eup %5777  ;;  %v1471_v22 = vsel %vm1469_vm4, %v5776_v18, 0 }
 0x21f   : > { %v1980_v23 = vmul.f32 %v1978_v19, %v1446_v7  ;;  %v1976_v24 = vmul.f32 0.6931472, %v5778_v21  ;;  %v1546_v25 = vand.u32 4294901760, %v1471_v22  ;;  %v1557_v26 = vsub.f32 %v1474_v17, %v1556_v20 }
 0x221   : > { %1983 = vst.msk [vmem:[#allocation3 + $0x8] sm:$0x3f] %vm1982_vm5, %v1980_v23  ;;  %v1979_v27 = vmul.f32 %v1976_v24, %v5974_v5  ;;  %v1547_v28 = vsub.f32 %v1471_v22, %v1546_v25  ;;  %v1558_v29 = vand.u32 4294901760, %v1557_v26 }
 0x223   : > { %1981 = vst.msk [vmem:[#allocation3] sm:$0xff] %vm1469_vm4, %v1979_v27  ;;  %v1548_v30 = vand.u32 4294901760, %v1547_v28  ;;  %v1559_v31 = vsub.f32 %v1557_v26, %v1558_v29 }
 0x225   : > { %v1549_v32 = vsub.f32 %v1547_v28, %v1548_v30  ;;  %v1560_v34 = vand.u32 4294901760, %v1559_v31 }
 0x227   : > { %v1550_v33 = vand.u32 4294901760, %v1549_v32 }
 0x229   : > { %5300 = vmatprep.mubr.f32.mxu0 %v1550_v33 }
 0x22a   : > { %5301 = vmatmul.mubr.f32.vlgmr.msra.gmra.mrb[2].mxu0 %v1560_v34 }
 0x22b   : > { %5304 = vmatpush3.msra.mxu0 %v1571_v4  ;;  %5305 = vmatprep.mubr.f32.mxu0 %v1546_v25 }
 0x22c   : > { %5308 = vmatprep.subr.mxu0 %v1568_v1 }
 0x232   : > { %5306 = vmatmul.mubr.f32.vlgmr.msra.gmra.mrb[2].mxu0 %v1556_v20 }
 0x233   : > { %5309 = vmatpush3.msra.mxu0 %v1568_v1  ;;  %5310 = vmatprep.mubr.f32.mxu0 %v1547_v28 }
 0x234   : > { %5313 = vmatprep.subr.mxu0 %v5969_v0 }
 0x23a   : > { %5311 = vmatmul.mubr.f32.vlgmr.msra.gmra.mrb[2].mxu0 %v1557_v26 }
 0x23b   : > { %5314 = vmatpush3.msra.mxu0 %v5969_v0  ;;  %5315 = vmatprep.mubr.f32.mxu0 %v1548_v30 }
 0x23c   : > { %5318 = vmatprep.subr.mxu0 %v1569_v2 }
 0x242   : > { %5316 = vmatmul.mubr.f32.vlgmr.msra.gmra.mrb[2].mxu0 %v1558_v29 }
 0x243   : > { %5319 = vmatpush3.msra.mxu0 %v1569_v2  ;;  %5320 = vmatprep.mubr.f32.mxu0 %v1546_v25 }
 0x244   : > { %5323 = vmatprep.subr.mxu0 %v5969_v0 }
 0x24a   : > { %5321 = vmatmul.mubr.f32.vlgmr.msra.gmra.mrb[2].mxu0 %v1556_v20 }
 0x24b   : > { %5324 = vmatpush3.msra.mxu0 %v5969_v0  ;;  %5325 = vmatprep.mubr.f32.mxu0 %v1546_v25 }
 0x252   : > { %5326 = vmatmul.mubr.f32.vlgmr.msra.gmra.mrb[2].mxu0 %v1556_v20 }
 0x325   : > { %v5327_v35 = vpop.f32.mrb[2].mxu0 }
 0x326   : > { %v1970_v36 = vmul.f32 %v5327_v35, %v5953_v48  ;;  %v1959_v37 = vpop.f32.mrb[3].mxu0 }
 0x327   : > { %v1969_v38 = vmul.f32 %v1959_v37, %v5956_v49 }
 0x328   : > { %v1972_v39 = vmul.f32 %v1970_v36, %v1446_v7 }
 0x329   : > { %v1971_v40 = vmul.f32 %v1969_v38, %v5974_v5 }
 0x32a   : > { %1974 = vst.msk [vmem:[#allocation2 + $0x8] sm:$0x3f] %vm915_vm1, %v1972_v39 }
 0x32b   : > { %1973 = vst.msk [vmem:[#allocation2] sm:$0xff] %vm913_vm2, %v1971_v40 }
 0x32c PF: > { %vm1991_vm6 = vcmask 1045504   ;;  %v5828_v43 = vmov 0.0|0.0   ;;  %v1984_v46 = vld [vmem:[%s5911_s24] sm:$0xff]  ;;  %vm1987_vm7 = vcmask 113664   ;;  %vm5829_vm8 = vmmov 0   ;;  %v2455_v4 = vld [vmem:[%s6136_s2 + $0x8] sm:$0xff] }
 0x32d   : > { %5589 = vmatprep.subr.bf16.mxu0 %v5828_v43  ;;  %5580 = vmatprep.subr.bf16.mxu1 %v5828_v43  ;;  %v5830_v48 = vmov 0.0   ;;  %v1989_v49 = vsel %vm1987_vm7, %v1984_v46, 0  ;;  %v2454_v3 = vld [vmem:[%s6136_s2] sm:$0xff]  ;;  %v2464_v6 = vand.u32 4294901760, %v2455_v4  ;;  %vm2456_vm9 = vcmask 130048   ;;  %p5045_p5 = scmp.ne.s32.totalorder %s5902_s18, 1 }
 0x32e   : > { %5353 = vmatprep.mubr.msk.f32.mxu0 %vm5829_vm8, %v5830_v48  ;;  %5332 = vmatprep.mubr.msk.f32.mxu1 %vm5829_vm8, %v5830_v48  ;;  %v2062_v51 = vand.u32 4294901760, %v1989_v49  ;;  %v2461_v5 = vand.u32 4294901760, %v2454_v3  ;;  %v2919_v30 = vld [vmem:[%s5916_s27] sm:$0xff]  ;;  %vm2921_vm10 = vcmask 64512   ;;  %v2920_v37 = vld [vmem:[%s5916_s27 + $0x8] sm:$0x3f] }
 0x32f   : > { %v2546_v9 = vsub.f32 %v2455_v4, %v2464_v6  ;;  %v2923_v31 = vsel %vm2921_vm10, %v2919_v30, 0  ;;  %v2926_v38 = vsel %vm2921_vm10, %v2920_v37, 0  ;;  %vm3971_vm11 = vcmask 1043456  }
 0x330   : > { %v2063_v54 = vsub.f32 %v1989_v49, %v2062_v51  ;;  %v5599_v7 = vpack.c.bf16 %v2464_v6, %v2461_v5  ;;  %v2539_v8 = vsub.f32 %v2454_v3, %v2461_v5  ;;  %v2994_v32 = vand.u32 4294901760, %v2923_v31  ;;  %v3417_v5 = vld [vmem:[%s5921_s30] sm:$0xff]  ;;  %v3418_v6 = vld [vmem:[%s5921_s30 + $0x8] sm:$0x3f] }
 0x331   : > { %v5992_v42 = vld [vmem:[#allocation2 + $0x8] sm:$0x3f]  ;;  %v2547_v11 = vand.u32 4294901760, %v2546_v9  ;;  %v3004_v39 = vand.u32 4294901760, %v2926_v38  ;;  %vm3964_vm12 = vcmask 31744   ;;  %vm4488_vm13 = vcmask 29696  }
 0x332   : > { %v5990_v41 = vld [vmem:[#allocation2] sm:$0xff]  ;;  %v1993_v44 = vsel %vm1991_vm6, %v5992_v42, 0  ;;  %v2064_v57 = vand.u32 4294901760, %v2063_v54  ;;  %v2540_v10 = vand.u32 4294901760, %v2539_v8  ;;  %v5605_v17 = vpack.c.bf16 %v2546_v9, %v2539_v8 }
 0x333   : > { %v1996_v45 = vand.u32 4294901760, %v5990_v41  ;;  %v1999_v47 = vand.u32 4294901760, %v1993_v44  ;;  %v2548_v13 = vsub.f32 %v2546_v9, %v2547_v11  ;;  %v2995_v33 = vsub.f32 %v2923_v31, %v2994_v32 }
 0x334   : > { %v2065_v61 = vsub.f32 %v2063_v54, %v2064_v57  ;;  %v2541_v12 = vsub.f32 %v2539_v8, %v2540_v10  ;;  %v5611_v18 = vpack.c.bf16 %v2547_v11, %v2540_v10  ;;  %v3005_v40 = vsub.f32 %v2926_v38, %v3004_v39  ;;  %v3420_v10 = vld [vmem:[#allocation4 + $0x8] sm:$0x3f]  ;;  %v3419_v11 = vld [vmem:[#allocation4] sm:$0xff] }
 0x335   : > { %v2074_v50 = vsub.f32 %v5990_v41, %v1996_v45  ;;  %v5581_v52 = vpack.c.bf16 %v1999_v47, %v1996_v45  ;;  %v2081_v53 = vsub.f32 %v1993_v44, %v1999_v47  ;;  %v2549_v15 = vand.u32 4294901760, %v2548_v13 }
 0x336   : > { %v2066_v0 = vand.u32 4294901760, %v2065_v61  ;;  %v2542_v14 = vand.u32 4294901760, %v2541_v12  ;;  %v2996_v34 = vand.u32 4294901760, %v2995_v33  ;;  %v3945_v8 = vsub.f32 1.0, %v3417_v5 }
 0x337   : > { %v2075_v55 = vand.u32 4294901760, %v2074_v50  ;;  %5591 = vmatpush3.bf16.msra.mxu0 %v5581_v52  ;;  %5582 = vmatpush3.bf16.msra.mxu1 %v5581_v52  ;;  %v2082_v56 = vand.u32 4294901760, %v2081_v53  ;;  %v5587_v2 = vpack.c.bf16 %v2081_v53, %v2074_v50  ;;  %v3946_v9 = vsub.f32 1.0, %v3418_v6 }
 0x338   : > { %5592 = vmatprep.subr.bf16.mxu0 %v5828_v43  ;;  %5583 = vmatprep.subr.bf16.mxu1 %v5828_v43  ;;  %v5602_v16 = vpack.c.bf16 %v2549_v15, %v2542_v14  ;;  %v2997_v35 = vsub.f32 %v2995_v33, %v2996_v34  ;;  %vm4473_vm14 = vcmask 128000   ;;  %vm5833_vm15 = vmmov (!%p5045_p5), 0  }
 0x339   : > { %v2076_v58 = vsub.f32 %v2074_v50, %v2075_v55  ;;  %v5593_v59 = vpack.c.bf16 %v2082_v56, %v2075_v55  ;;  %v2083_v60 = vsub.f32 %v2081_v53, %v2082_v56  ;;  %v3423_v53 = vld [vmem:[%s6137_s3] sm:$0xff]  ;;  %vm4962_vm0 = vcmask (!%p5045_p5), 25600  }
 0x33a   : > { %5354 = vmatmul.mubr.f32.vlgmr.msra.gmra.mrb[0].mxu0 %v2064_v57  ;;  %5333 = vmatmul.mubr.f32.vlgmr.msra.gmra.mrb[0].mxu1 %v2066_v0  ;;  %v2998_v36 = vand.u32 4294901760, %v2997_v35  ;;  %v3432_v55 = vand.u32 4294901760, %v3423_v53 }
 0x33b   : > { %v2077_v62 = vand.u32 4294901760, %v2076_v58  ;;  %5594 = vmatpush3.bf16.msra.mxu0 %v5593_v59  ;;  %5360 = vmatprep.mubr.msk.f32.mxu0 %vm5829_vm8, %v5830_v48  ;;  %v2084_v63 = vand.u32 4294901760, %v2083_v60 }
 0x33c   : > { %5595 = vmatprep.subr.bf16.mxu0 %v5828_v43  ;;  %5339 = vmatprep.mubr.msk.f32.mxu1 %vm5829_vm8, %v5830_v48  ;;  %v3520_v58 = vsub.f32 %v3423_v53, %v3432_v55 }
 0x33d   : > { %v5584_v1 = vpack.c.bf16 %v2084_v63, %v2077_v62 }
 0x33e   : > { %v3521_v60 = vand.u32 4294901760, %v3520_v58 }
 0x33f   : > { %5585 = vmatpush3.bf16.msra.mxu1 %v5584_v1 }
 0x340   : > { %5586 = vmatprep.subr.bf16.mxu1 %v5828_v43  ;;  %v3522_v62 = vsub.f32 %v3520_v58, %v3521_v60 }
 0x342   : > { %5361 = vmatmul.mubr.f32.vlgmr.msra.gmra.mrb[0].mxu0 %v2062_v51  ;;  %5340 = vmatmul.mubr.f32.vlgmr.msra.gmra.mrb[0].mxu1 %v2062_v51  ;;  %v3523_v0 = vand.u32 4294901760, %v3522_v62 }
 0x343   : > { %5597 = vmatpush3.bf16.msra.mxu0 %v5581_v52  ;;  %5367 = vmatprep.mubr.msk.f32.mxu0 %vm5829_vm8, %v5830_v48 }
 0x344   : > { %5588 = vmatpush3.bf16.msra.mxu1 %v5587_v2  ;;  %5346 = vmatprep.mubr.msk.f32.mxu1 %vm5829_vm8, %v5830_v48 }
 0x345   : > { %5598 = vmatprep.subr.bf16.mxu1 %v5828_v43 }
 0x34a   : > { %5368 = vmatmul.mubr.f32.vlgmr.msra.gmra.mrb[0].mxu0 %v2062_v51  ;;  %5347 = vmatmul.mubr.f32.vlgmr.msra.gmra.mrb[0].mxu1 %v2063_v54  ;;  %v3424_v54 = vld [vmem:[%s6137_s3 + $0x8] sm:$0xff] }
 0x34b   : > { %5374 = vmatprep.mubr.msk.f32.mxu1 %vm5829_vm8, %v5830_v48  ;;  %5600 = vmatpush3.bf16.msra.mxu1 %v5599_v7  ;;  %v3435_v56 = vand.u32 4294901760, %v3424_v54 }
 0x34c   : > { %5601 = vmatprep.subr.bf16.mxu1 %v5828_v43  ;;  %5414 = vmatprep.mubr.f32.mxu0 %v2998_v36 }
 0x34d   : > { %v5616_v57 = vpack.c.bf16 %v3435_v56, %v3432_v55  ;;  %v3527_v59 = vsub.f32 %v3424_v54, %v3435_v56  ;;  %v4482_v56 = vld [vmem:[#allocation3 + $0x8] sm:$0x3f] }
 0x34f   : > { %v3528_v61 = vand.u32 4294901760, %v3527_v59  ;;  %v5624_v3 = vpack.c.bf16 %v3527_v59, %v3520_v58 }
 0x351   : > { %v3529_v63 = vsub.f32 %v3527_v59, %v3528_v61  ;;  %v5632_v4 = vpack.c.bf16 %v3528_v61, %v3521_v60 }
 0x353   : > { %v3530_v1 = vand.u32 4294901760, %v3529_v63 }
 0x355   : > { %v5620_v2 = vpack.c.bf16 %v3530_v1, %v3523_v0 }
 0x41d   : > { %v2450_v19 = vpop.f32.mrb[0].mxu0  ;;  %v2225_v21 = vpop.f32.mrb[0].mxu1 }
 0x41e   : > { %v5369_v20 = vpop.f32.mrb[1].mxu0  ;;  %v5688_v22 = vadd.f32 %v2450_v19, %v2225_v21  ;;  %v5348_v23 = vpop.f32.mrb[1].mxu1 }
 0x420   : > { %v2458_v24 = vsel %vm2456_vm9, %v5688_v22, 0 }
 0x421   : > { %v2527_v25 = vand.u32 4294901760, %v2458_v24 }
 0x423   : > { %v2528_v26 = vsub.f32 %v2458_v24, %v2527_v25 }
 0x425   : > { %v2529_v27 = vand.u32 4294901760, %v2528_v26 }
 0x427   : > { %v2530_v28 = vsub.f32 %v2528_v26, %v2529_v27 }
 0x429   : > { %v2531_v29 = vand.u32 4294901760, %v2530_v28  ;;  %v3963_v28 = vld [vmem:[%s6138_s4] sm:$0xf] }
 0x42b   : > { %5375 = vmatmul.mubr.f32.vlgmr.msra.gmra.mrb[2].mxu1 %v2531_v29  ;;  %v3973_v29 = vsel %vm3971_vm11, %v3963_v28, 0 }
 0x42c   : > { %5603 = vmatpush3.bf16.msra.mxu1 %v5602_v16  ;;  %5381 = vmatprep.mubr.msk.f32.mxu1 %vm5829_vm8, %v5830_v48  ;;  %v6064_v30 = vand.u32 4294901760, %v3973_v29 }
 0x42d   : > { %5604 = vmatprep.subr.bf16.mxu1 %v5828_v43 }
 0x42e   : > { %v4063_v31 = vsub.f32 %v3973_v29, %v6064_v30 }
 0x433   : > { %5382 = vmatmul.mubr.f32.vlgmr.msra.gmra.mrb[2].mxu1 %v2527_v25 }
 0x434   : > { %5606 = vmatpush3.bf16.msra.mxu1 %v5605_v17  ;;  %5388 = vmatprep.mubr.msk.f32.mxu1 %vm5829_vm8, %v5830_v48 }
 0x435   : > { %5607 = vmatprep.subr.bf16.mxu1 %v5828_v43 }
 0x43b   : > { %5389 = vmatmul.mubr.f32.vlgmr.msra.gmra.mrb[2].mxu1 %v2528_v26 }
 0x43c   : > { %5609 = vmatpush3.bf16.msra.mxu1 %v5599_v7  ;;  %5395 = vmatprep.mubr.msk.f32.mxu1 %vm5829_vm8, %v5830_v48 }
 0x43d   : > { %5610 = vmatprep.subr.bf16.mxu1 %v5828_v43 }
 0x443   : > { %5396 = vmatmul.mubr.f32.vlgmr.msra.gmra.mrb[2].mxu1 %v2529_v27 }
 0x444   : > { %5612 = vmatpush3.bf16.msra.mxu1 %v5611_v18  ;;  %5402 = vmatprep.mubr.msk.f32.mxu1 %vm5829_vm8, %v5830_v48 }
 0x445   : > { %5613 = vmatprep.subr.bf16.mxu1 %v5828_v43  ;;  %v3006_v43 = vand.u32 4294901760, %v3005_v40 }
 0x447   : > { %v3007_v44 = vsub.f32 %v3005_v40, %v3006_v43 }
 0x44b   : > { %5403 = vmatmul.mubr.f32.vlgmr.msra.gmra.mrb[2].mxu1 %v2527_v25 }
 0x44c   : > { %5615 = vmatpush3.bf16.msra.mxu1 %v5599_v7  ;;  %5409 = vmatprep.mubr.msk.f32.mxu1 %vm5829_vm8, %v5830_v48  ;;  %v3008_v48 = vand.u32 4294901760, %v3007_v44  ;;  %v5831_v7 = vmov 0  }
 0x44d   : > { %5617 = vmatprep.subr.bf16.mxu1 %v5616_v57  ;;  %5779 = vset.pattern.permute.xlu0 %v5831_v7 }
 0x44e   : > { %5780 = vset.pattern.permute.xlu1 %v5831_v7  ;;  %3935 = vperm.xlu0 %5779, %v3417_v5  }
 0x44f   : > { %3949 = vperm.xlu1 %5780, %v3945_v8  }
 0x452   : > { %3940 = vperm.xlu0 %5779, %v3418_v6  }
 0x453   : > { %5410 = vmatmul.mubr.f32.vlgmr.msra.gmra.mrb[2].mxu1 %v2527_v25  ;;  %3954 = vperm.xlu1 %5780, %v3946_v9  }
 0x454   : > { %5619 = vmatpush3.bf16.msra.mxu1 %v5616_v57 }
 0x455   : > { %5621 = vmatprep.subr.bf16.mxu1 %v5620_v2 }
 0x4cd   : > { %v6069_v35 = vpop.permute.xlu0 %3935 }
 0x4ce   : > { %v6071_v36 = vpop.permute.xlu1 %3949 }
 0x4d1   : > { %v6073_v37 = vpop.permute.xlu0 %3940 }
 0x4d2   : > { %v3955_v44 = vpop.permute.xlu1 %3954 }
 0x4d3   : > { %v4484_v0 = vmul.f32 %v4482_v56, %v3955_v44 }
 0x526   : > { %v2915_v45 = vpop.f32.mrb[2].mxu1 }
 0x527   : > { %v2929_v46 = vand.u32 4294901760, %v2915_v45  ;;  %v5411_v47 = vpop.f32.mrb[3].mxu1 }
 0x529   : > { %v3016_v49 = vsub.f32 %v2915_v45, %v2929_v46  ;;  %5412 = vmatprep.subr.mxu0 %v2929_v46 }
 0x52a   : > { %5413 = vmatpush3.msra.mxu0 %v2929_v46 }
 0x52b   : > { %5415 = vmatmul.mubr.f32.vlgmr.msra.gmra.mrb[2].mxu0 %v3008_v48  ;;  %v3017_v50 = vand.u32 4294901760, %v3016_v49 }
 0x52c   : > { %5419 = vmatprep.mubr.f32.mxu0 %v2994_v32 }
 0x52d   : > { %v3018_v51 = vsub.f32 %v3016_v49, %v3017_v50 }
 0x52f   : > { %v3019_v52 = vand.u32 4294901760, %v3018_v51  ;;  %v4481_v51 = vld [vmem:[#allocation3] sm:$0xff] }
 0x530   : > { %v4483_v60 = vmul.f32 %v4481_v51, %v6071_v36 }
 0x531   : > { %5417 = vmatprep.subr.mxu0 %v3019_v52 }
 0x532   : > { %5418 = vmatpush3.msra.mxu0 %v3019_v52 }
 0x533   : > { %5420 = vmatmul.mubr.f32.vlgmr.msra.gmra.mrb[2].mxu0 %v3004_v39  ;;  %5422 = vmatprep.subr.mxu0 %v3016_v49 }
 0x534   : > { %5423 = vmatpush3.msra.mxu0 %v3016_v49  ;;  %5424 = vmatprep.mubr.f32.mxu0 %v2995_v33 }
 0x535   : > { %5427 = vmatprep.subr.mxu0 %v2929_v46 }
 0x53b   : > { %5425 = vmatmul.mubr.f32.vlgmr.msra.gmra.mrb[2].mxu0 %v3005_v40 }
 0x53c   : > { %5428 = vmatpush3.msra.mxu0 %v2929_v46  ;;  %5429 = vmatprep.mubr.f32.mxu0 %v2996_v34 }
 0x53d   : > { %5432 = vmatprep.subr.mxu0 %v3017_v50 }
 0x543   : > { %5430 = vmatmul.mubr.f32.vlgmr.msra.gmra.mrb[2].mxu0 %v3006_v43 }
 0x544   : > { %5433 = vmatpush3.msra.mxu0 %v3017_v50  ;;  %5434 = vmatprep.mubr.f32.mxu0 %v2994_v32 }
 0x545   : > { %5437 = vmatprep.subr.mxu0 %v2929_v46 }
 0x54b   : > { %5435 = vmatmul.mubr.f32.vlgmr.msra.gmra.mrb[2].mxu0 %v3004_v39 }
 0x54c   : > { %5438 = vmatpush3.msra.mxu0 %v2929_v46  ;;  %5439 = vmatprep.mubr.f32.mxu0 %v2994_v32  ;;  %v4064_v32 = vand.u32 4294901760, %v4063_v31 }
 0x54d   : > { %5484 = vmatprep.subr.mxu0 %v6064_v30 }
 0x54e   : > { %v4065_v33 = vsub.f32 %v4063_v31, %v4064_v32 }
 0x550   : > { %v4066_v34 = vand.u32 4294901760, %v4065_v33 }
 0x553   : > { %5440 = vmatmul.mubr.f32.vlgmr.msra.gmra.mrb[2].mxu0 %v3004_v39 }
 0x554   : > { %5485 = vmatpush3.msra.mxu0 %v6064_v30 }
 0x555   : > { %5489 = vmatprep.subr.mxu0 %v4066_v34 }
 0x626   : > { %v5441_v12 = vpop.f32.mrb[2].mxu0 }
 0x627   : > { %v6053_v13 = vmul.f32 %v5441_v12, %v3420_v10  ;;  %v3407_v14 = vpop.f32.mrb[3].mxu0 }
 0x628   : > { %v6055_v15 = vmul.f32 %v3419_v11, %v3407_v14  ;;  %v4469_v14 = vmul.f32 %v3955_v44, %v5992_v42 }
 0x629   : > { %v3429_v16 = vsel %vm2456_vm9, %v6053_v13, 0 }
 0x62a   : > { %v3508_v17 = vand.u32 4294901760, %v3429_v16  ;;  %v3426_v18 = vsel %vm2456_vm9, %v6055_v15, 0 }
 0x62b   : > { %v3498_v19 = vand.u32 4294901760, %v3426_v18 }
 0x62c   : > { %v3509_v20 = vsub.f32 %v3429_v16, %v3508_v17 }
 0x62d   : > { %v3499_v21 = vsub.f32 %v3426_v18, %v3498_v19 }
 0x62e   : > { %v3510_v22 = vand.u32 4294901760, %v3509_v20 }
 0x62f   : > { %v3500_v23 = vand.u32 4294901760, %v3499_v21 }
 0x630   : > { %v3511_v24 = vsub.f32 %v3509_v20, %v3510_v22 }
 0x631   : > { %v3501_v25 = vsub.f32 %v3499_v21, %v3500_v23 }
 0x632   : > { %v3512_v27 = vand.u32 4294901760, %v3511_v24  ;;  %v5834_v24 = vmov (!%p5045_p5), 0.0  }
 0x633   : > { %v3502_v26 = vand.u32 4294901760, %v3501_v25 }
 0x635   : > { %5446 = vmatprep.mubr.f32.mxu1 %v3502_v26 }
 0x636   : > { %5447 = vmatmul.mubr.f32.vlgmr.msra.gmra.mrb[4].mxu1 %v3512_v27 }
 0x637   : > { %5453 = vmatprep.mubr.f32.mxu1 %v3498_v19  ;;  %5623 = vmatpush3.bf16.msra.mxu1 %v5620_v2 }
 0x638   : > { %5625 = vmatprep.subr.bf16.mxu1 %v5624_v3 }
 0x63e   : > { %5454 = vmatmul.mubr.f32.vlgmr.msra.gmra.mrb[4].mxu1 %v3508_v17 }
 0x63f   : > { %5460 = vmatprep.mubr.f32.mxu1 %v3499_v21  ;;  %5627 = vmatpush3.bf16.msra.mxu1 %v5624_v3  ;;  %v5832_v21 = vmov (!%p5045_p5), 0.0|0.0  }
 0x640   : > { %5629 = vmatprep.subr.bf16.mxu1 %v5616_v57 }
 0x646   : > { %5461 = vmatmul.mubr.f32.vlgmr.msra.gmra.mrb[4].mxu1 %v3509_v20 }
 0x647   : > { %5467 = vmatprep.mubr.f32.mxu1 %v3500_v23  ;;  %5631 = vmatpush3.bf16.msra.mxu1 %v5616_v57 }
 0x648   : > { %5633 = vmatprep.subr.bf16.mxu1 %v5632_v4 }
 0x64e   : > { %5468 = vmatmul.mubr.f32.vlgmr.msra.gmra.mrb[4].mxu1 %v3510_v22 }
 0x64f   : > { %5474 = vmatprep.mubr.f32.mxu1 %v3498_v19  ;;  %5635 = vmatpush3.bf16.msra.mxu1 %v5632_v4 }
 0x650   : > { %5637 = vmatprep.subr.bf16.mxu1 %v5616_v57 }
 0x656   : > { %5475 = vmatmul.mubr.f32.vlgmr.msra.gmra.mrb[4].mxu1 %v3508_v17 }
 0x657   : > { %5481 = vmatprep.mubr.f32.mxu1 %v3498_v19  ;;  %5639 = vmatpush3.bf16.msra.mxu1 %v5616_v57 }
 0x658   : > { %5640 = vmatprep.subr.bf16.mxu1 (!%p5045_p5), %v5832_v21 }
 0x65e   : > { %5482 = vmatmul.mubr.f32.vlgmr.msra.gmra.mrb[4].mxu1 %v3508_v17  ;;  %v4468_v17 = vmul.f32 %v6071_v36, %v5990_v41  ;;  %v4494_v41 = vld [vmem:[%s6141_s7] sm:$0x3] (!%p5045_p5) }
 0x65f   : > { %v4498_v25 = vsel (!%p5045_p5), %vm1987_vm7, %v4494_v41, 0  ;;  %5518 = vmatprep.mubr.msk.f32.mxu1 (!%p5045_p5), %vm5833_vm15, %v5834_v24 }
 0x660   : > { %v4570_v27 = vand.u32 (!%p5045_p5), 4294901760, %v4498_v25 }
 0x731   : > { %v5483_v38 = vpop.f32.mrb[4].mxu1 }
 0x732   : > { %v3944_v39 = vmul.f32 %v5483_v38, %v6073_v37  ;;  %v3923_v40 = vpop.f32.mrb[5].mxu1 }
 0x733   : > { %v3943_v43 = vmul.f32 %v6069_v35, %v3923_v40 }
 0x734   : > { %v3958_v45 = vadd.f32 %v3955_v44, %v3944_v39 }
 0x735   : > { %v3957_v46 = vadd.f32 %v6071_v36, %v3943_v43 }
 0x736   : > { %5781 = vrcp.f32 %v3958_v45 }
 0x737   : > { %5783 = vrcp.f32 %v3957_v46 }
 0x738   : > { %5785 = vlog2.f32 %v3957_v46 }
 0x739   : > { %5787 = vlog2.f32 %v3958_v45 }
 0x740   : > { %v5782_v47 = vpop.eup %5781 }
 0x741   : > { %v5784_v48 = vpop.eup %5783  ;;  %v3969_v49 = vsel %vm3964_vm12, %v5782_v47, 0 }
 0x742   : > { %v5786_v50 = vpop.eup %5785  ;;  %v3966_v52 = vsel %vm3964_vm12, %v5784_v48, 0  ;;  %v4051_v53 = vand.u32 4294901760, %v3969_v49 }
 0x743   : > { %v5788_v54 = vpop.eup %5787  ;;  %v4476_v55 = vmul.f32 0.6931472, %v5786_v50  ;;  %v4041_v57 = vand.u32 4294901760, %v3966_v52 }
 0x744   : > { %v4478_v58 = vmul.f32 0.6931472, %v5788_v54  ;;  %v4052_v59 = vsub.f32 %v3969_v49, %v4051_v53 }
 0x745   : > { %v4479_v61 = vmul.f32 %v4476_v55, %v6069_v35  ;;  %v4042_v62 = vsub.f32 %v3966_v52, %v4041_v57 }
 0x746   : > { %v4480_v63 = vmul.f32 %v4478_v58, %v6073_v37  ;;  %v4053_v1 = vand.u32 4294901760, %v4052_v59 }
 0x747   : > { %v4485_v2 = vadd.f32 %v4483_v60, %v4479_v61  ;;  %v4043_v3 = vand.u32 4294901760, %v4042_v62 }
 0x748   : > { %v4486_v4 = vadd.f32 %v4484_v0, %v4480_v63  ;;  %v4054_v5 = vsub.f32 %v4052_v59, %v4053_v1 }
 0x749   : > { %v4044_v6 = vsub.f32 %v4042_v62, %v4043_v3  ;;  %4487 = vst.msk [vmem:[#allocation3] sm:$0xff] %vm3964_vm12, %v4485_v2 }
 0x74a   : > { %4489 = vst.msk [vmem:[#allocation3 + $0x8] sm:$0x3f] %vm4488_vm13, %v4486_v4  ;;  %v4055_v8 = vand.u32 4294901760, %v4054_v5 }
 0x74b   : > { %v4045_v7 = vand.u32 4294901760, %v4044_v6 }
 0x74d   : > { %5486 = vmatprep.mubr.f32.mxu0 %v4045_v7 }
 0x74e   : > { %5487 = vmatmul.mubr.f32.vlgmr.msra.gmra.mrb[4].mxu0 %v4055_v8 }
 0x74f   : > { %5491 = vmatprep.mubr.f32.mxu0 %v4041_v57  ;;  %5490 = vmatpush3.msra.mxu0 %v4066_v34 }
 0x750   : > { %5494 = vmatprep.subr.mxu0 %v4063_v31 }
 0x756   : > { %5492 = vmatmul.mubr.f32.vlgmr.msra.gmra.mrb[4].mxu0 %v4051_v53 }
 0x757   : > { %5496 = vmatprep.mubr.f32.mxu0 %v4042_v62  ;;  %5495 = vmatpush3.msra.mxu0 %v4063_v31 }
 0x758   : > { %5499 = vmatprep.subr.mxu0 %v6064_v30 }
 0x75e   : > { %5497 = vmatmul.mubr.f32.vlgmr.msra.gmra.mrb[4].mxu0 %v4052_v59 }
 0x75f   : > { %5501 = vmatprep.mubr.f32.mxu0 %v4043_v3  ;;  %5500 = vmatpush3.msra.mxu0 %v6064_v30 }
 0x760   : > { %5504 = vmatprep.subr.mxu0 %v4064_v32 }
 0x766   : > { %5502 = vmatmul.mubr.f32.vlgmr.msra.gmra.mrb[4].mxu0 %v4053_v1 }
 0x767   : > { %5506 = vmatprep.mubr.f32.mxu0 %v4041_v57  ;;  %5505 = vmatpush3.msra.mxu0 %v4064_v32 }
 0x768   : > { %5509 = vmatprep.subr.mxu0 %v6064_v30 }
 0x76e   : > { %5507 = vmatmul.mubr.f32.vlgmr.msra.gmra.mrb[4].mxu0 %v4051_v53 }
 0x76f   : > { %5511 = vmatprep.mubr.f32.mxu0 %v4041_v57  ;;  %5510 = vmatpush3.msra.mxu0 %v6064_v30  ;;  %v4571_v30 = vsub.f32 (!%p5045_p5), %v4498_v25, %v4570_v27 }
 0x770   : > { %5649 = vmatprep.subr.bf16.mxu0 (!%p5045_p5), %v5832_v21 }
 0x771   : > { %v4572_v33 = vand.u32 (!%p5045_p5), 4294901760, %v4571_v30 }
 0x776   : > { %5512 = vmatmul.mubr.f32.vlgmr.msra.gmra.mrb[4].mxu0 %v4051_v53 }
 0x777   : > { %5539 = vmatprep.mubr.msk.f32.mxu0 (!%p5045_p5), %vm5833_vm15, %v5834_v24 }
 0x849   : > { %v5513_v9 = vpop.f32.mrb[4].mxu0 }
 0x84a   : > { %v4465_v10 = vmul.f32 %v5513_v9, %v6053_v13  ;;  %v4454_v11 = vpop.f32.mrb[5].mxu0  ;;  %v4495_v13 = vld [vmem:[#allocation3] sm:$0xff] (!%p5045_p5) }
 0x84b   : > { %v4464_v12 = vmul.f32 %v4454_v11, %v6055_v15  ;;  %4493 = sbr.rel (%p5045_p5) target bundleno = 2363 (0x93b), region = 72  ;;  %v4496_v15 = vld [vmem:[#allocation3 + $0x8] sm:$0x3f] (!%p5045_p5)  ;;  %v4504_v22 = vand.u32 (!%p5045_p5), 4294901760, %v4495_v13 }
 0x84c   : > { %v4467_v16 = vmul.f32 %v4465_v10, %v6073_v37  ;;  %v4501_v42 = vsel (!%p5045_p5), %vm1991_vm6, %v4496_v15, 0  ;;  %v4573_v37 = vsub.f32 (!%p5045_p5), %v4571_v30, %v4572_v33 }
 0x84d   : > { %v4466_v18 = vmul.f32 %v4464_v12, %v6069_v35  ;;  %v4507_v23 = vand.u32 (!%p5045_p5), 4294901760, %v4501_v42  ;;  %v4582_v26 = vsub.f32 (!%p5045_p5), %v4495_v13, %v4504_v22 }
 0x84e   : > { %v4471_v19 = vadd.f32 %v4469_v14, %v4467_v16  ;;  %v4574_v40 = vand.u32 (!%p5045_p5), 4294901760, %v4573_v37 }
 0x84f   : > { %v4470_v20 = vadd.f32 %v4468_v17, %v4466_v18  ;;  %v5641_v28 = vpack.c.bf16 (!%p5045_p5), %v4507_v23, %v4504_v22  ;;  %v4589_v29 = vsub.f32 (!%p5045_p5), %v4501_v42, %v4507_v23  ;;  %v4583_v31 = vand.u32 (!%p5045_p5), 4294901760, %v4582_v26 }
 0x850   : > { %4474 = vst.msk [vmem:[#allocation2 + $0x8] sm:$0x3f] %vm4473_vm14, %v4471_v19 }
 0x851   : > { %4472 = vst.msk [vmem:[#allocation2] sm:$0xff] %vm2456_vm9, %v4470_v20  ;;  %5651 = vmatpush3.bf16.msra.mxu0 (!%p5045_p5), %v5641_v28  ;;  %5642 = vmatpush3.bf16.msra.mxu1 (!%p5045_p5), %v5641_v28  ;;  %v4590_v32 = vand.u32 (!%p5045_p5), 4294901760, %v4589_v29  ;;  %v4584_v34 = vsub.f32 (!%p5045_p5), %v4582_v26, %v4583_v31  ;;  %v5647_v44 = vpack.c.bf16 (!%p5045_p5), %v4589_v29, %v4582_v26 }
 0x852   : > { %5643 = vmatprep.subr.bf16.mxu1 %v5832_v21  ;;  %5652 = vmatprep.subr.bf16.mxu0 %v5832_v21 }
 0x853   : > { %v4591_v35 = vsub.f32 %v4589_v29, %v4590_v32  ;;  %v5653_v36 = vpack.c.bf16 %v4590_v32, %v4583_v31  ;;  %v4585_v38 = vand.u32 4294901760, %v4584_v34 }
 0x854   : > { %5540 = vmatmul.mubr.f32.vlgmr.msra.gmra.mrb[0].mxu0 %v4572_v33  ;;  %5519 = vmatmul.mubr.f32.vlgmr.msra.gmra.mrb[0].mxu1 %v4574_v40 }
 0x855   : > { %v4592_v39 = vand.u32 4294901760, %v4591_v35  ;;  %5654 = vmatpush3.bf16.msra.mxu0 %v5653_v36  ;;  %5546 = vmatprep.mubr.msk.f32.mxu0 %vm5833_vm15, %v5834_v24 }
 0x856   : > { %5655 = vmatprep.subr.bf16.mxu0 %v5832_v21  ;;  %5525 = vmatprep.mubr.msk.f32.mxu1 %vm5833_vm15, %v5834_v24 }
 0x857   : > { %v5644_v43 = vpack.c.bf16 %v4592_v39, %v4585_v38 }
 0x859   : > { %5645 = vmatpush3.bf16.msra.mxu1 %v5644_v43 }
 0x85a   : > { %5646 = vmatprep.subr.bf16.mxu1 %v5832_v21 }
 0x85c   : > { %5547 = vmatmul.mubr.f32.vlgmr.msra.gmra.mrb[0].mxu0 %v4570_v27  ;;  %5526 = vmatmul.mubr.f32.vlgmr.msra.gmra.mrb[0].mxu1 %v4570_v27 }
 0x85d   : > { %5657 = vmatpush3.bf16.msra.mxu0 %v5641_v28  ;;  %5553 = vmatprep.mubr.msk.f32.mxu0 %vm5833_vm15, %v5834_v24 }
 0x85e   : > { %5648 = vmatpush3.bf16.msra.mxu1 %v5647_v44  ;;  %5532 = vmatprep.mubr.msk.f32.mxu1 %vm5833_vm15, %v5834_v24 }
 0x864   : > { %5554 = vmatmul.mubr.f32.vlgmr.msra.gmra.mrb[0].mxu0 %v4570_v27  ;;  %5533 = vmatmul.mubr.f32.vlgmr.msra.gmra.mrb[0].mxu1 %v4571_v30 }
 0x937   : > { %v4958_v45 = vpop.f32.mrb[0].mxu0  ;;  %v4733_v47 = vpop.f32.mrb[0].mxu1 }
 0x938   : > { %v5555_v46 = vpop.f32.mrb[1].mxu0  ;;  %v5737_v48 = vadd.f32 %v4958_v45, %v4733_v47  ;;  %v5534_v49 = vpop.f32.mrb[1].mxu1 }
 0x93a   : > { %4963 = vst.msk [vmem:[#allocation5] sm:$0x3] %vm4962_vm0, %v5737_v48 }
 0x93b PF: > { %p5750_p6 = scmp.eq.s32.totalorder %s5902_s18, 1  ;;  %s5835_s29 = smov [#allocation5]  }
 0x93c   : > { %s4971_s12 = sshll.u32 %s5835_s29, 4  ;;  %s4972_s12 = int_to_ptr.vmem [resolvable:$true] %s4971_s12 }
 0x93d   : > { %s5789_s13 = scalar_lea.vmem %s4972_s12, 32  ;;  %p5796_p10 = scmp.lt.s32.totalorder %s4972_s12, %s4972_s12 }
 0x93e   : > { %p5790_p7 = scmp.ne.s32.totalorder %s4972_s12, %s5789_s13  ;;  %p5797_p11 = scmp.lt.s32.totalorder %s5789_s13, %s5789_s13 }
 0x940   : > { %p5791_p8 = pnand %p5790_p7, %p5750_p6  ;;  %p5798_p12 = por %p5797_p11, %p5796_p10 }
 0x942   : > { %p5792_p9 = pneg %p5791_p8 }
 0x944   : > { %p5799_p13 = pnand %p5798_p12, %p5792_p9 }
 0x946   : > { %5802 = shalt.err (!%p5799_p13)
}
 0x947   : > { %s5803_s24 = scalar_lea.hbm %s6145_s11, 32 }
 0x948   : > { %p5804_p0 = scmp.ne.s32.totalorder %s6145_s11, %s5803_s24  ;;  %p5809_p3 = scmp.lt.u32.totalorder %s5803_s24, %s6145_s11 }
 0x94a   : > { %p5805_p1 = pnand %p5804_p0, %p5750_p6 }
 0x94c   : > { %p5806_p2 = pneg %p5805_p1 }
 0x94e   : > { %p5811_p4 = pnand %p5809_p3, %p5806_p2 }
 0x950   : > { %5814 = shalt.err (!%p5811_p4)
}
 0x951   : > { %5747 = dma.vmem_to_hbm [thread:$0]  (%p5750_p6), %s4972_s12, 32, %s6145_s11, [#allocation6]  }
 0x952   : > { %5820 = dma.done.wait (%p5750_p6), [#allocation6], 32  }
 0x953   : > { %5822 = vsyncadd (%p5750_p6), [#allocation6], 4294967264 }
 0x954 PF: > { %s22_s17 = sadd.s32 1, %s5825_s17  }
 0x955   : > { %p19_p5 = scmp.ge.s32.totalorder %s22_s17, 4  }
 0x957   :  { %21 = sbr.rel (!%p19_p5) target bundleno = 1 (0x1), region = 105 }
 0x95e   :  { %4984 = vsyncpa [#allocation6], 1 }
 0x95f   :  { %4986 = vsyncpa [#allocation6 + $0x1], 1 }

</bundles_post_ra>
